<compile_context>
chip_gen: v5e
topology: v5e:2x2
jax: 0.10.0
libtpu: 0.0.40
codegen_flags: <defaults>
</compile_context>

<pallas_src>
import numpy as np
import jax
import jax.numpy as jnp
from jax.experimental import pallas as pl
from jax.experimental.pallas import tpu as pltpu

LANE = 128     # lane width (last dim)
SUBLANE = 8    # f32 sublane width (second-to-last dim)


def _round_up(x, m):
    return (x + m - 1) // m * m


def _cdiv(a, b):
    return (a + b - 1) // b


# ----------------------------------------------------------------------------
# Kernel: one batch tile; all weights/biases VMEM-resident across grid steps.
# ----------------------------------------------------------------------------
def critic_fm_kernel(x_ref, w1_ref, b1_ref, w2_ref, b2_ref, wo_ref, bo_ref,
                     out_ref):
    cdt = w1_ref.dtype                       # compute/storage dtype (f32 or bf16)
    x = x_ref[...].astype(cdt)

    # hl1 + ReLU   (K = ci, unpadded; MXU slack makes this irrelevant)
    z1 = jnp.dot(x, w1_ref[...], preferred_element_type=jnp.float32) + b1_ref[...]
    z1 = jnp.maximum(z1, 0.0).astype(cdt)

    # hl2 + ReLU
    z2 = jnp.dot(z1, w2_ref[...], preferred_element_type=jnp.float32) + b2_ref[...]
    z2 = jnp.maximum(z2, 0.0).astype(cdt)

    # fused output head [q | s]: narrow (1+nb_state) output, one matmul + store
    out_ref[...] = (jnp.dot(z2, wo_ref[...], preferred_element_type=jnp.float32)
                    + bo_ref[...]).astype(out_ref.dtype)


# ----------------------------------------------------------------------------
# Batch-tile selection: large tiles, minimal tail waste, >= 2 grid steps so
# the batch axis can shard across v7x's 2 TensorCores (harmless on v5e/v6e).
# ----------------------------------------------------------------------------
def _choose_batch_tile(B, block_b):
    target_steps = max(2, _cdiv(B, block_b))
    tb = _round_up(max(_cdiv(B, target_steps), 1), SUBLANE)
    return max(SUBLANE, min(tb, _round_up(block_b, SUBLANE)))


# ----------------------------------------------------------------------------
# Wrapper
# ----------------------------------------------------------------------------
def critic_fm_forward(x, pp, nb_state, *, block_b=512):
    """x: [B, ci] (f32 or bf16).  pp: params from pad_and_fuse_params."""
    B, ci = x.shape
    w1, b1 = pp["w1"], pp["b1"]
    w2, b2 = pp["w2"], pp["b2"]
    wo, bo = pp["wo"], pp["bo"]

    assert w1.shape[0] == ci, "w1 must be [ci, h1_p] with ci unpadded"
    h1_p = w1.shape[1]
    h2_p = w2.shape[1]
    head = wo.shape[1]
    assert head == 1 + nb_state

    tb = _choose_batch_tile(B, block_b)
    b_p = _round_up(B, tb)
    grid = (b_p // tb,)

    # Batch-only padding (no feature padding); skipped entirely if aligned.
    x_p = x if b_p == B else jnp.pad(x, ((0, b_p - B), (0, 0)))

    out = pl.pallas_call(
        critic_fm_kernel,
        out_shape=jax.ShapeDtypeStruct((b_p, head), jnp.float32),
        grid=grid,
        in_specs=[
            pl.BlockSpec((tb, ci), lambda i: (i, 0)),      # x tile (pipelined), ci unpadded
            pl.BlockSpec((ci, h1_p), lambda i: (0, 0)),    # resident weights/biases
            pl.BlockSpec((1, h1_p), lambda i: (0, 0)),
            pl.BlockSpec((h1_p, h2_p), lambda i: (0, 0)),
            pl.BlockSpec((1, h2_p), lambda i: (0, 0)),
            pl.BlockSpec((h2_p, head), lambda i: (0, 0)),
            pl.BlockSpec((1, head), lambda i: (0, 0)),
        ],
        out_specs=pl.BlockSpec((tb, head), lambda i: (i, 0)),   # narrow, unpadded head
        compiler_params=pltpu.CompilerParams(
            dimension_semantics=("parallel",)),            # megacore sharding on v7x
    )(x_p, w1, b1, w2, b2, wo, bo)

    q = out[:B, :1]
    s = out[:B, 1:]
    return q, s


# ----------------------------------------------------------------------------
# Parameter init (mirrors Critic_Fm.init_weights) + hardware-shape prep
# ----------------------------------------------------------------------------
def init_params(key, nb_state, nb_action, nb_goal, hidden1, hidden2, init_w=0.003):
    """Deterministic init mirroring Critic_Fm.init_weights.

    fanin_init uses bound = 1/sqrt(weight.size(0)) = 1/sqrt(out_features)
    (reproduced exactly, including that quirk).  Output heads use
    uniform(-init_w, init_w).  Biases keep PyTorch's default Linear bias init
    bound = 1/sqrt(in_features).  Weights stored as [in, out].
    """
    ci = nb_state + nb_action + nb_goal
    ks = jax.random.split(key, 8)

    def unif(k, shape, bound):
        return jax.random.uniform(k, shape, jnp.float32, -bound, bound)

    w1 = unif(ks[0], (ci, hidden1), 1.0 / np.sqrt(hidden1))       # fanin_init on (h1, ci)
    b1 = unif(ks[1], (1, hidden1), 1.0 / np.sqrt(ci))
    w2 = unif(ks[2], (hidden1, hidden2), 1.0 / np.sqrt(hidden2))  # fanin_init on (h2, h1)
    b2 = unif(ks[3], (1, hidden2), 1.0 / np.sqrt(hidden1))
    wv = unif(ks[4], (hidden2, 1), init_w)
    bv = unif(ks[5], (1, 1), 1.0 / np.sqrt(hidden2))
    ws = unif(ks[6], (hidden2, nb_state), init_w)
    bs = unif(ks[7], (1, nb_state), 1.0 / np.sqrt(hidden2))

    return dict(w1=w1, b1=b1, w2=w2, b2=b2, wv=wv, bv=bv, ws=ws, bs=bs)


def pad_and_fuse_params(p, weight_dtype=jnp.float32):
    """Fuse olv|ols into one head; pad only the hidden dims to 128.

    ci (layer-1 in-features) and the fused head width (1+nb_state) stay
    unpadded — their blocks use the full array dim, saving HBM traffic.
    Padded hidden lanes carry zeros through ReLU, so results are unchanged.
    """
    ci, h1 = p["w1"].shape
    h2 = p["w2"].shape[1]
    nb_state = p["ws"].shape[1]
    head = 1 + nb_state

    h1_p = _round_up(h1, LANE)
    h2_p = _round_up(h2, LANE)

    def pad2(a, rows, cols):
        return jnp.zeros((rows, cols), a.dtype).at[:a.shape[0], :a.shape[1]].set(a)

    wo = jnp.concatenate([p["wv"], p["ws"]], axis=1)   # [h2, 1+nb_state]
    bo = jnp.concatenate([p["bv"], p["bs"]], axis=1)   # [1, 1+nb_state]

    return dict(
        w1=pad2(p["w1"], ci, h1_p).astype(weight_dtype),
        b1=pad2(p["b1"], 1, h1_p),                      # biases stay f32
        w2=pad2(p["w2"], h1_p, h2_p).astype(weight_dtype),
        b2=pad2(p["b2"], 1, h2_p),
        wo=pad2(wo, h2_p, head).astype(weight_dtype),
        bo=bo,
    )


def reference_forward(x, p):
    z1 = jnp.maximum(x @ p["w1"] + p["b1"], 0.0)
    z2 = jnp.maximum(z1 @ p["w2"] + p["b2"], 0.0)
    return z2 @ p["wv"] + p["bv"], z2 @ p["ws"] + p["bs"]


if __name__ == "__main__":
    # Small shapes consistent with the module: ci = nb_state + nb_action + nb_goal
    nb_state, nb_action, nb_goal = 8, 4, 4
    hidden1, hidden2 = 32, 32
    ci = nb_state + nb_action + nb_goal

    key = jax.random.PRNGKey(0)
    kx1, kx2, kp = jax.random.split(key, 3)
    params = init_params(kp, nb_state, nb_action, nb_goal, hidden1, hidden2)

    # ---- case 1: tiny aligned batch, f32 weights (tight check) ----
    B1 = 8
    x1 = jax.random.normal(kx1, (B1, ci), jnp.float32)
    q_ref1, s_ref1 = reference_forward(x1, params)

    pp32 = pad_and_fuse_params(params, jnp.float32)
    q1, s1 = critic_fm_forward(x1, pp32, nb_state)
    q1, s1 = jax.block_until_ready((q1, s1))
    np.testing.assert_allclose(np.asarray(q1), np.asarray(q_ref1), rtol=1e-5, atol=1e-5)
    np.testing.assert_allclose(np.asarray(s1), np.asarray(s_ref1), rtol=1e-5, atol=1e-5)
    assert q1.shape == (B1, 1) and s1.shape == (B1, nb_state)

    # ---- case 2: unaligned batch (exercises batch-pad + multi-step grid) ----
    B2 = 20
    x2 = jax.random.normal(kx2, (B2, ci), jnp.float32)
    q_ref2, s_ref2 = reference_forward(x2, params)
    q2, s2 = critic_fm_forward(x2, pp32, nb_state)
    q2, s2 = jax.block_until_ready((q2, s2))
    np.testing.assert_allclose(np.asarray(q2), np.asarray(q_ref2), rtol=1e-5, atol=1e-5)
    np.testing.assert_allclose(np.asarray(s2), np.asarray(s_ref2), rtol=1e-5, atol=1e-5)
    assert q2.shape == (B2, 1) and s2.shape == (B2, nb_state)

    # ---- case 3: bf16 weight storage (fast MXU path), looser tolerance ----
    pp16 = pad_and_fuse_params(params, jnp.bfloat16)
    q16, s16 = critic_fm_forward(x1, pp16, nb_state)
    q16, s16 = jax.block_until_ready((q16, s16))
    np.testing.assert_allclose(np.asarray(q16), np.asarray(q_ref1), rtol=1e-1, atol=2e-3)
    np.testing.assert_allclose(np.asarray(s16), np.asarray(s_ref1), rtol=1e-1, atol=2e-3)

    print("KERNEL_OK")
</pallas_src>

<mosaic_0001>
module attributes {stable_mosaic.version = 11 : i64} {
  func.func @critic_fm_kernel(%arg0: i32, %arg1: memref<8x16xf32, #tpu.memory_space<vmem>>, %arg2: memref<16x128xf32, #tpu.memory_space<vmem>>, %arg3: memref<1x128xf32, #tpu.memory_space<vmem>>, %arg4: memref<128x128xf32, #tpu.memory_space<vmem>>, %arg5: memref<1x128xf32, #tpu.memory_space<vmem>>, %arg6: memref<128x9xf32, #tpu.memory_space<vmem>>, %arg7: memref<1x9xf32, #tpu.memory_space<vmem>>, %arg8: memref<8x9xf32, #tpu.memory_space<vmem>>) attributes {dimension_semantics = [#tpu.dimension_semantics<parallel>], iteration_bounds = array<i64: 1>, scalar_prefetch = 0 : i64, scratch_operands = 0 : i64, tpu.core_type = #tpu.core_type<tc>, window_params = [{transform_indices = @transform_0, window_bounds = array<i64: 8, 16>}, {pipeline_mode = #tpu.pipeline_mode<synchronous>, transform_indices = @transform_1, window_bounds = array<i64: 16, 128>}, {pipeline_mode = #tpu.pipeline_mode<synchronous>, transform_indices = @transform_2, window_bounds = array<i64: 1, 128>}, {pipeline_mode = #tpu.pipeline_mode<synchronous>, transform_indices = @transform_3, window_bounds = array<i64: 128, 128>}, {pipeline_mode = #tpu.pipeline_mode<synchronous>, transform_indices = @transform_4, window_bounds = array<i64: 1, 128>}, {pipeline_mode = #tpu.pipeline_mode<synchronous>, transform_indices = @transform_5, window_bounds = array<i64: 128, 9>}, {pipeline_mode = #tpu.pipeline_mode<synchronous>, transform_indices = @transform_6, window_bounds = array<i64: 1, 9>}, {transform_indices = @transform_7, window_bounds = array<i64: 8, 9>}]} {
    %c0 = arith.constant 0 : index
    %c0_0 = arith.constant 0 : index
    %0 = vector.load %arg1[%c0, %c0_0] : memref<8x16xf32, #tpu.memory_space<vmem>>, vector<8x16xf32>
    %c0_1 = arith.constant 0 : index
    %c0_2 = arith.constant 0 : index
    %1 = vector.load %arg2[%c0_1, %c0_2] : memref<16x128xf32, #tpu.memory_space<vmem>>, vector<16x128xf32>
    %cst = arith.constant dense<0.000000e+00> : vector<8x128xf32>
    %2 = tpu.matmul %0, %1, %cst {dimension_numbers = #tpu.dot_dimension_numbers<[1], [0], [0], [1], [0, 0, 1, 1], [], []>} : vector<8x16xf32>, vector<16x128xf32>, vector<8x128xf32> -> vector<8x128xf32>
    %c0_3 = arith.constant 0 : index
    %c0_4 = arith.constant 0 : index
    %3 = vector.load %arg3[%c0_3, %c0_4] : memref<1x128xf32, #tpu.memory_space<vmem>>, vector<1x128xf32>
    %4 = vector.broadcast %3 : vector<1x128xf32> to vector<8x128xf32>
    %5 = arith.addf %2, %4 : vector<8x128xf32>
    %cst_5 = arith.constant 0.000000e+00 : f32
    %6 = vector.broadcast %cst_5 : f32 to vector<8x128xf32>
    %7 = arith.maximumf %5, %6 : vector<8x128xf32>
    %c0_6 = arith.constant 0 : index
    %c0_7 = arith.constant 0 : index
    %8 = vector.load %arg4[%c0_6, %c0_7] : memref<128x128xf32, #tpu.memory_space<vmem>>, vector<128x128xf32>
    %cst_8 = arith.constant dense<0.000000e+00> : vector<8x128xf32>
    %9 = tpu.matmul %7, %8, %cst_8 {dimension_numbers = #tpu.dot_dimension_numbers<[1], [0], [0], [1], [0, 0, 1, 1], [], []>} : vector<8x128xf32>, vector<128x128xf32>, vector<8x128xf32> -> vector<8x128xf32>
    %c0_9 = arith.constant 0 : index
    %c0_10 = arith.constant 0 : index
    %10 = vector.load %arg5[%c0_9, %c0_10] : memref<1x128xf32, #tpu.memory_space<vmem>>, vector<1x128xf32>
    %11 = vector.broadcast %10 : vector<1x128xf32> to vector<8x128xf32>
    %12 = arith.addf %9, %11 : vector<8x128xf32>
    %cst_11 = arith.constant 0.000000e+00 : f32
    %13 = vector.broadcast %cst_11 : f32 to vector<8x128xf32>
    %14 = arith.maximumf %12, %13 : vector<8x128xf32>
    %c0_12 = arith.constant 0 : index
    %c0_13 = arith.constant 0 : index
    %15 = vector.load %arg6[%c0_12, %c0_13] : memref<128x9xf32, #tpu.memory_space<vmem>>, vector<128x9xf32>
    %cst_14 = arith.constant dense<0.000000e+00> : vector<8x9xf32>
    %16 = tpu.matmul %14, %15, %cst_14 {dimension_numbers = #tpu.dot_dimension_numbers<[1], [0], [0], [1], [0, 0, 1, 1], [], []>} : vector<8x128xf32>, vector<128x9xf32>, vector<8x9xf32> -> vector<8x9xf32>
    %c0_15 = arith.constant 0 : index
    %c0_16 = arith.constant 0 : index
    %17 = vector.load %arg7[%c0_15, %c0_16] : memref<1x9xf32, #tpu.memory_space<vmem>>, vector<1x9xf32>
    %18 = vector.broadcast %17 : vector<1x9xf32> to vector<8x9xf32>
    %19 = arith.addf %16, %18 : vector<8x9xf32>
    %c0_17 = arith.constant 0 : index
    %c0_18 = arith.constant 0 : index
    %20 = vector.load %arg8[%c0_17, %c0_18] : memref<8x9xf32, #tpu.memory_space<vmem>>, vector<8x9xf32>
    tpu.vector_store %arg8[%c0_17, %c0_18], %19 {strides = array<i32>} : memref<8x9xf32, #tpu.memory_space<vmem>>, vector<8x9xf32>,
    return
  }
  func.func @transform_0(%arg0: i32) -> (i32, i32) {
    %c0_i32 = arith.constant 0 : i32
    %c0_i32_0 = arith.constant 0 : i32
    return %arg0, %c0_i32 : i32, i32
  }
  func.func @transform_1(%arg0: i32) -> (i32, i32) {
    %c0_i32 = arith.constant 0 : i32
    %c0_i32_0 = arith.constant 0 : i32
    %c0_i32_1 = arith.constant 0 : i32
    return %c0_i32, %c0_i32_0 : i32, i32
  }
  func.func @transform_2(%arg0: i32) -> (i32, i32) {
    %c0_i32 = arith.constant 0 : i32
    %c0_i32_0 = arith.constant 0 : i32
    %c0_i32_1 = arith.constant 0 : i32
    return %c0_i32, %c0_i32_0 : i32, i32
  }
  func.func @transform_3(%arg0: i32) -> (i32, i32) {
    %c0_i32 = arith.constant 0 : i32
    %c0_i32_0 = arith.constant 0 : i32
    %c0_i32_1 = arith.constant 0 : i32
    return %c0_i32, %c0_i32_0 : i32, i32
  }
  func.func @transform_4(%arg0: i32) -> (i32, i32) {
    %c0_i32 = arith.constant 0 : i32
    %c0_i32_0 = arith.constant 0 : i32
    %c0_i32_1 = arith.constant 0 : i32
    return %c0_i32, %c0_i32_0 : i32, i32
  }
  func.func @transform_5(%arg0: i32) -> (i32, i32) {
    %c0_i32 = arith.constant 0 : i32
    %c0_i32_0 = arith.constant 0 : i32
    %c0_i32_1 = arith.constant 0 : i32
    return %c0_i32, %c0_i32_0 : i32, i32
  }
  func.func @transform_6(%arg0: i32) -> (i32, i32) {
    %c0_i32 = arith.constant 0 : i32
    %c0_i32_0 = arith.constant 0 : i32
    %c0_i32_1 = arith.constant 0 : i32
    return %c0_i32, %c0_i32_0 : i32, i32
  }
  func.func @transform_7(%arg0: i32) -> (i32, i32) {
    %c0_i32 = arith.constant 0 : i32
    %c0_i32_0 = arith.constant 0 : i32
    return %arg0, %c0_i32 : i32, i32
  }
}

</mosaic_0001>

<bundles_post_ra>
// kernel: tpu_custom_call.1
= control target key start
LH: loop header
LB: loop body
LE: loop exit
PB: predicated region body
PF: predicated region fallthrough
CT: control target
= control target key end

     0   :  { %12 = vsyncpa [#allocation3], 0  ;;  %s390_s0 = inlined_call_operand.hbm [shape: f32[8,16], index: 0, kind: input, shape index: {}]   ;;  %s391_s1 = inlined_call_operand.vmem [shape: f32[16,128], index: 1, kind: input, shape index: {}]   ;;  %s392_s2 = inlined_call_operand.vmem [shape: f32[1,128], index: 2, kind: input, shape index: {}]   ;;  %s393_s3 = inlined_call_operand.vmem [shape: f32[128,128], index: 3, kind: input, shape index: {}]   ;;  %s394_s4 = inlined_call_operand.vmem [shape: f32[1,128], index: 4, kind: input, shape index: {}]   ;;  %s395_s5 = inlined_call_operand.vmem [shape: f32[128,9], index: 5, kind: input, shape index: {}]   ;;  %s396_s6 = inlined_call_operand.vmem [shape: f32[1,9], index: 6, kind: input, shape index: {}]   ;;  %s397_s7 = inlined_call_operand.hbm [shape: f32[8,9], index: 7, kind: output, shape index: {}]  }
   0x1   :  { %13 = vsyncpa [#allocation4], 0  ;;  %s19_s26 = sshll.u32 %s390_s0, 4  ;;  %s231_s27 = smov [#allocation2]   ;;  %s20_s26 = int_to_ptr.hbm [resolvable:$true] %s19_s26 }
   0x2   :  { %s21_s28 = sshll.u32 %s231_s27, 4  ;;  %s22_s28 = int_to_ptr.vmem [resolvable:$true] %s21_s28 }
   0x3   :  { %24 = dma.hbm_to_vmem [thread:$0]  %s20_s26, 128, %s22_s28, [#allocation3]  }
   0x4   :  { %227 = dma.done.wait [#allocation3], 128  }
   0x5   :  { %228 = vsyncadd [#allocation3], 4294967168  ;;  %v43_v0 = vld [vmem:[%s391_s1 + $0x8] sm:$0xff]  ;;  %v42_v1 = vld [vmem:[%s391_s1] sm:$0xff]  ;;  %vm48_vm0 = vcmask 130048   ;;  %s232_s25 = smov [#allocation5]  }
   0x6   :  { %66 = vmatpush.msra.mxu0 %v43_v0  ;;  %v41_v2 = vld [vmem:[#allocation2] sm:$0xff]  ;;  %v88_v3 = vld [vmem:[%s393_s3 + $0x78] sm:$0xff]  ;;  %v87_v4 = vld [vmem:[%s393_s3 + $0x70] sm:$0xff]  ;;  %s161_s26 = sshll.u32 %s232_s25, 4  ;;  %s163_s29 = sshll.u32 %s397_s7, 4  ;;  %vm154_vm1 = vcmask 72704   ;;  %s162_s26 = int_to_ptr.vmem [resolvable:$true] %s161_s26  ;;  %s164_s29 = int_to_ptr.hbm [resolvable:$true] %s163_s29 }
   0x7   :  { %93 = vmatpush.msra.mxu1 %v88_v3  ;;  %v86_v5 = vld [vmem:[%s393_s3 + $0x68] sm:$0xff]  ;;  %v85_v6 = vld [vmem:[%s393_s3 + $0x60] sm:$0xff]  ;;  %v84_v7 = vld [vmem:[%s393_s3 + $0x58] sm:$0xff] }
   0x8   :  { %67 = vmatpush.msra.mxu0 %v42_v1  ;;  %v83_v8 = vld [vmem:[%s393_s3 + $0x50] sm:$0xff]  ;;  %v82_v9 = vld [vmem:[%s393_s3 + $0x48] sm:$0xff]  ;;  %v81_v10 = vld [vmem:[%s393_s3 + $0x40] sm:$0xff] }
   0x9   :  { %173 = vmatmul.msk.f32.vlgmr.msra.gmra.mxu0 %vm48_vm0, %v41_v2  ;;  %94 = vmatpush.msra.mxu1 %v87_v4  ;;  %v80_v11 = vld [vmem:[%s393_s3 + $0x38] sm:$0xff]  ;;  %v79_v12 = vld [vmem:[%s393_s3 + $0x30] sm:$0xff]  ;;  %v78_v13 = vld [vmem:[%s393_s3 + $0x28] sm:$0xff] }
   0xa   :  { %v77_v14 = vld [vmem:[%s393_s3 + $0x20] sm:$0xff]  ;;  %v76_v15 = vld [vmem:[%s393_s3 + $0x18] sm:$0xff]  ;;  %v75_v16 = vld [vmem:[%s393_s3 + $0x10] sm:$0xff] }
   0xb   :  { %95 = vmatpush.msra.mxu1 %v86_v5  ;;  %v74_v17 = vld [vmem:[%s393_s3 + $0x8] sm:$0xff]  ;;  %v73_v18 = vld [vmem:[%s393_s3] sm:$0xff]  ;;  %v129_v19 = vld [vmem:[%s395_s5 + $0x78] sm:$0xff] }
   0xc   :  { %v128_v20 = vld [vmem:[%s395_s5 + $0x70] sm:$0xff]  ;;  %134 = vmatpush.msra.mxu2 %v129_v19  ;;  %v127_v21 = vld [vmem:[%s395_s5 + $0x68] sm:$0xff]  ;;  %v126_v22 = vld [vmem:[%s395_s5 + $0x60] sm:$0xff] }
   0xd   :  { %96 = vmatpush.msra.mxu1 %v85_v6  ;;  %v125_v23 = vld [vmem:[%s395_s5 + $0x58] sm:$0xff]  ;;  %v124_v24 = vld [vmem:[%s395_s5 + $0x50] sm:$0xff]  ;;  %v123_v25 = vld [vmem:[%s395_s5 + $0x48] sm:$0xff] }
   0xe   :  { %135 = vmatpush.msra.mxu2 %v128_v20  ;;  %v122_v26 = vld [vmem:[%s395_s5 + $0x40] sm:$0xff]  ;;  %v121_v27 = vld [vmem:[%s395_s5 + $0x38] sm:$0xff]  ;;  %v120_v28 = vld [vmem:[%s395_s5 + $0x30] sm:$0xff] }
   0xf   :  { %97 = vmatpush.msra.mxu1 %v84_v7  ;;  %v119_v29 = vld [vmem:[%s395_s5 + $0x28] sm:$0xff]  ;;  %v118_v30 = vld [vmem:[%s395_s5 + $0x20] sm:$0xff]  ;;  %v117_v31 = vld [vmem:[%s395_s5 + $0x18] sm:$0xff] }
  0x10   :  { %136 = vmatpush.msra.mxu2 %v127_v21  ;;  %v176_v32 = vld [vmem:[%s392_s2] ss:$0 sm:$0xff]  ;;  %v116_v36 = vld [vmem:[%s395_s5 + $0x10] sm:$0xff]  ;;  %v115_v37 = vld [vmem:[%s395_s5 + $0x8] sm:$0xff] }
  0x11   :  { %98 = vmatpush.msra.mxu1 %v83_v8  ;;  %v114_v38 = vld [vmem:[%s395_s5] sm:$0xff] }
  0x12   :  { %137 = vmatpush.msra.mxu2 %v126_v22  ;;  %v177_v39 = vld [vmem:[%s394_s4] ss:$0 sm:$0xff] }
  0x13   :  { %99 = vmatpush.msra.mxu1 %v82_v9  ;;  %v178_v43 = vld [vmem:[%s396_s6] ss:$0 sm:$0xff] }
  0x14   :  { %138 = vmatpush.msra.mxu2 %v125_v23 }
  0x15   :  { %100 = vmatpush.msra.mxu1 %v81_v10 }
  0x16   :  { %139 = vmatpush.msra.mxu2 %v124_v24 }
  0x17   :  { %101 = vmatpush.msra.mxu1 %v80_v11 }
  0x18   :  { %140 = vmatpush.msra.mxu2 %v123_v25 }
  0x19   :  { %102 = vmatpush.msra.mxu1 %v79_v12 }
  0x1a   :  { %141 = vmatpush.msra.mxu2 %v122_v26 }
  0x1b   :  { %103 = vmatpush.msra.mxu1 %v78_v13 }
  0x1c   :  { %142 = vmatpush.msra.mxu2 %v121_v27 }
  0x1d   :  { %104 = vmatpush.msra.mxu1 %v77_v14 }
  0x1e   :  { %143 = vmatpush.msra.mxu2 %v120_v28 }
  0x1f   :  { %105 = vmatpush.msra.mxu1 %v76_v15 }
  0x20   :  { %144 = vmatpush.msra.mxu2 %v119_v29 }
  0x21   :  { %106 = vmatpush.msra.mxu1 %v75_v16 }
  0x22   :  { %145 = vmatpush.msra.mxu2 %v118_v30 }
  0x23   :  { %107 = vmatpush.msra.mxu1 %v74_v17 }
  0x24   :  { %146 = vmatpush.msra.mxu2 %v117_v31 }
  0x25   :  { %108 = vmatpush.msra.mxu1 %v73_v18 }
  0x26   :  { %147 = vmatpush.msra.mxu2 %v116_v36 }
  0x28   :  { %148 = vmatpush.msra.mxu2 %v115_v37 }
  0x2a   :  { %149 = vmatpush.msra.mxu2 %v114_v38 }
  0x86   :  { %v69_v33 = vpop.f32.mrf.mxu0 }
  0x87   :  { %v70_v34 = vadd.f32 %v176_v32, %v69_v33 }
  0x89   :  { %v72_v35 = vmax.f32 %v70_v34, 0.0 }
  0x8b   :  { %109 = vmatmul.f32.vlgmr.msra.gmra.mxu1 %v72_v35 }
 0x108   :  { %v110_v40 = vpop.f32.mrf.mxu1 }
 0x109   :  { %v111_v41 = vadd.f32 %v177_v39, %v110_v40 }
 0x10b   :  { %v113_v42 = vmax.f32 %v111_v41, 0.0 }
 0x10d   :  { %150 = vmatmul.f32.vlgmr.msra.gmra.mxu2 %v113_v42 }
 0x190   :  { %v151_v44 = vpop.f32.mrf.mxu2 }
 0x191   :  { %v152_v45 = vadd.f32 %v178_v43, %v151_v44 }
 0x193   :  { %155 = vst.msk [vmem:[#allocation5] sm:$0xff] %vm154_vm1, %v152_v45 }
 0x194   :  { %166 = dma.vmem_to_hbm [thread:$0]  %s162_s26, 128, %s164_s29, [#allocation4]  }
 0x195   :  { %229 = dma.done.wait [#allocation4], 128  }
 0x196   :  { %230 = vsyncadd [#allocation4], 4294967168 }
 0x197   :  { %171 = vsyncpa [#allocation3], 1 }
 0x198   :  { %172 = vsyncpa [#allocation4], 1 }

</bundles_post_ra>
